<compile_context>
chip_gen: v7x
topology: tpu7x:2x2x1
jax: 0.10.0
libtpu: 0.0.40
codegen_flags: <defaults>
</compile_context>

<pallas_src>
import functools

import jax
import jax.numpy as jnp
from jax.experimental import pallas as pl
from jax.experimental.pallas import tpu as pltpu


def _round_up(x, m):
    return ((x + m - 1) // m) * m


def _layernorm_kernel(x_ref, o_ref, *, bias_free: bool):
    # Block view is (bt, C, hw_tile): C on sublanes, spatial positions on lanes.
    x = x_ref[...].astype(jnp.float32)
    # Channel reductions -> sublane/XLU, which is otherwise idle here.
    mu = jnp.mean(x, axis=1, keepdims=True)
    diff = x - mu
    # torch.var(unbiased=False): mean of squared deviations (two-pass; robust
    # against the E[x^2]-mu^2 cancellation issue).
    var = jnp.mean(diff * diff, axis=1, keepdims=True)
    inv = jax.lax.rsqrt(var + 1e-5)
    y = (x if bias_free else diff) * inv   # BiasFree: x*inv ; WithBias: (x-mu)*inv
    o_ref[...] = y.astype(o_ref.dtype)     # single lane-dense store per tile


def _vmem_capacity_bytes():
    """Physical VMEM per TensorCore (128 MiB v5e/v6e, 64 MiB v7x)."""
    try:
        cap = getattr(pltpu.get_tpu_info(), "vmem_capacity_bytes", None)
        if cap:
            return int(cap)
    except Exception:
        pass
    return 64 << 20   # conservative fallback (v7x per-core)


def _balance_hw_tile(b_blocks, hw, hw_tile):
    """Nudge hw_tile so the number of parallel grid steps is even (v7x 2 TCs).

    Costs nothing on v5e/v6e (single TC); up to 2x wall-clock win on v7x for
    batch==1 / odd-block shapes.
    """
    n_hw = pl.cdiv(hw, hw_tile)
    if (b_blocks * n_hw) % 2 == 0:
        return hw_tile
    if hw < 256:
        return hw_tile          # can't split into two lane-dense (>=128) blocks
    for target in range(n_hw + 1, n_hw + 5):
        cand = _round_up(pl.cdiv(hw, target), 128)
        if (b_blocks * pl.cdiv(hw, cand)) % 2 == 0:
            return cand
    return hw_tile              # accept slight imbalance (e.g. 3-vs-2 blocks)


def _choose_tiling(b, c, hw, dtype):
    """Pick (bt, hw_tile, vmem_limit_bytes).

    Buffer model per lane of the block:
      * 4 pipeline buffers (2x in + 2x out, double-buffered) at the TRUE
        itemsize, with C padded to the dtype's sublane packing multiple.
      * ~3 full-tile f32 intermediates inside the kernel (x, diff, y), with C
        padded to 8 sublanes.
    """
    itemsize = int(dtype.itemsize)
    sub_in = max(8, (8 * 4) // itemsize)      # f32->8, bf16->16, int8/fp8->32
    c_in = _round_up(c, sub_in)               # sublane-padded C, input dtype
    c_f32 = _round_up(c, 8)                   # sublane-padded C, f32 scratch
    bytes_per_lane = 4 * c_in * itemsize + 3 * c_f32 * 4

    cap = _vmem_capacity_bytes()
    vmem_limit = int(min((cap * 3) // 4, 96 << 20))   # 48 MiB v7x, 96 MiB v5e/v6e
    budget = (vmem_limit * 2) // 3                    # headroom for Mosaic scratch

    if hw < 128:
        # Pack several batch elements per block to amortize per-step overhead;
        # the sub-128-lane masked store is unavoidable in this layout.
        per_batch = max(1, bytes_per_lane * hw)
        bt = max(1, min(b, budget // per_batch))
        if b >= 2:
            bt = min(bt, (b + 1) // 2)   # keep >= 2 grid steps for v7x 2 TCs
        return bt, hw, vmem_limit

    lanes = budget // bytes_per_lane
    lanes = min(lanes, 65536)
    hw_tile = max(128, (lanes // 128) * 128)
    hw_tile = min(hw_tile, (hw // 128) * 128)          # multiple of 128, <= hw
    hw_tile = _balance_hw_tile(b, hw, hw_tile)
    return 1, hw_tile, vmem_limit


def layernorm_nchw(x, layernorm_type: str = "WithBias"):
    """Pallas equivalent of LayerNorm(dim, LayerNorm_type).forward on NCHW."""
    b, c, h, w = x.shape
    hw = h * w
    x3 = x.reshape(b, c, hw)                            # free contiguous reshape
    bt, hw_tile, vmem_limit = _choose_tiling(b, c, hw, x.dtype)
    grid = (pl.cdiv(b, bt), pl.cdiv(hw, hw_tile))
    # Ragged last blocks (batch or hw) are fine: OOB rows/lanes are padded on
    # read and clipped on write; the reduction is over C (fully in-block), so
    # no garbage reaches the output.
    kernel = functools.partial(
        _layernorm_kernel, bias_free=(layernorm_type == "BiasFree"))
    cost = pl.CostEstimate(
        flops=7 * b * c * hw,                 # sums, diffs, squares, scale
        transcendentals=b * hw,               # one rsqrt per normalized position
        bytes_accessed=2 * b * c * hw * int(x.dtype.itemsize),
    )
    out = pl.pallas_call(
        kernel,
        out_shape=jax.ShapeDtypeStruct((b, c, hw), x.dtype),
        grid=grid,
        in_specs=[pl.BlockSpec((bt, c, hw_tile), lambda i, j: (i, 0, j))],
        out_specs=pl.BlockSpec((bt, c, hw_tile), lambda i, j: (i, 0, j)),
        compiler_params=pltpu.CompilerParams(
            dimension_semantics=("parallel", "parallel"),
            vmem_limit_bytes=vmem_limit),
        cost_estimate=cost,
    )(x3)
    return out.reshape(b, c, h, w)


def _reference(x, layernorm_type: str = "WithBias"):
    # Pure-JAX reference mirroring the PyTorch module (to_3d -> body -> to_4d).
    x3d = jnp.transpose(x, (0, 2, 3, 1)).astype(jnp.float32)   # b h w c
    mu = jnp.mean(x3d, axis=-1, keepdims=True)
    var = jnp.mean((x3d - mu) ** 2, axis=-1, keepdims=True)
    if layernorm_type == "BiasFree":
        y = x3d / jnp.sqrt(var + 1e-5)
    else:
        y = (x3d - mu) / jnp.sqrt(var + 1e-5)
    return jnp.transpose(y, (0, 3, 1, 2)).astype(x.dtype)


if __name__ == "__main__":
    key = jax.random.PRNGKey(0)
    k1, k2, k3, k4 = jax.random.split(key, 4)

    # Main case: NCHW input as the PyTorch module expects.
    x = jax.random.normal(k1, (2, 4, 16, 16), dtype=jnp.float32)
    out = jax.block_until_ready(layernorm_nchw(x, "WithBias"))
    assert out.shape == x.shape and out.dtype == x.dtype
    assert jnp.allclose(out, _reference(x, "WithBias"), atol=1e-5, rtol=1e-5)

    # BiasFree variant.
    out_bf = jax.block_until_ready(layernorm_nchw(x, "BiasFree"))
    assert jnp.allclose(out_bf, _reference(x, "BiasFree"), atol=1e-5, rtol=1e-5)

    # Ragged spatial extent (hw = 130 -> tile 128 + clipped remainder block).
    x_rag = jax.random.normal(k2, (1, 4, 10, 13), dtype=jnp.float32)
    out_rag = jax.block_until_ready(layernorm_nchw(x_rag, "WithBias"))
    assert jnp.allclose(out_rag, _reference(x_rag, "WithBias"),
                        atol=1e-5, rtol=1e-5)

    # Tiny spatial extent (hw = 64 < 128 -> batch-blocked path, bt >= 1).
    x_small = jax.random.normal(k3, (2, 4, 8, 8), dtype=jnp.float32)
    out_small = jax.block_until_ready(layernorm_nchw(x_small, "WithBias"))
    assert jnp.allclose(out_small, _reference(x_small, "WithBias"),
                        atol=1e-5, rtol=1e-5)

    # batch=1, hw=256 -> hw tiling is split to 2 blocks for v7x core balance.
    x_bal = jax.random.normal(k4, (1, 8, 16, 16), dtype=jnp.float32)
    out_bal = jax.block_until_ready(layernorm_nchw(x_bal, "WithBias"))
    assert jnp.allclose(out_bal, _reference(x_bal, "WithBias"),
                        atol=1e-5, rtol=1e-5)

    # bf16 input: true-itemsize buffer sizing path + f32 in-kernel accumulation.
    x_bf16 = jax.random.normal(k1, (2, 4, 16, 16), dtype=jnp.bfloat16)
    out_b16 = jax.block_until_ready(layernorm_nchw(x_bf16, "WithBias"))
    assert out_b16.dtype == jnp.bfloat16
    assert jnp.allclose(out_b16.astype(jnp.float32),
                        _reference(x_bf16, "WithBias").astype(jnp.float32),
                        atol=2e-2, rtol=2e-2)

    print("KERNEL_OK")
</pallas_src>

<mosaic_0001>
module attributes {stable_mosaic.version = 11 : i64} {
  func.func @_layernorm_kernel(%arg0: i32, %arg1: i32, %arg2: memref<1x4x256xf32, #tpu.memory_space<vmem>>, %arg3: memref<1x4x256xf32, #tpu.memory_space<vmem>>) attributes {dimension_semantics = [#tpu.dimension_semantics<parallel>, #tpu.dimension_semantics<parallel>], iteration_bounds = array<i64: 2, 1>, scalar_prefetch = 0 : i64, scratch_operands = 0 : i64, tpu.core_type = #tpu.core_type<tc>, window_params = [{transform_indices = @transform_0, window_bounds = array<i64: 1, 4, 256>}, {transform_indices = @transform_1, window_bounds = array<i64: 1, 4, 256>}]} {
    %c0 = arith.constant 0 : index
    %c0_0 = arith.constant 0 : index
    %c0_1 = arith.constant 0 : index
    %0 = vector.load %arg2[%c0, %c0_0, %c0_1] : memref<1x4x256xf32, #tpu.memory_space<vmem>>, vector<1x4x256xf32>
    %cst = arith.constant dense<0.000000e+00> : vector<1x256xf32>
    %1 = vector.multi_reduction <add>, %0, %cst [1] : vector<1x4x256xf32> to vector<1x256xf32>
    %2 = vector.shape_cast %1 : vector<1x256xf32> to vector<1x1x256xf32>
    %cst_2 = arith.constant 4.000000e+00 : f32
    %3 = vector.broadcast %cst_2 : f32 to vector<1x1x256xf32>
    %4 = arith.divf %2, %3 : vector<1x1x256xf32>
    %5 = vector.broadcast %4 : vector<1x1x256xf32> to vector<1x4x256xf32>
    %6 = arith.subf %0, %5 : vector<1x4x256xf32>
    %7 = arith.mulf %6, %6 : vector<1x4x256xf32>
    %cst_3 = arith.constant dense<0.000000e+00> : vector<1x256xf32>
    %8 = vector.multi_reduction <add>, %7, %cst_3 [1] : vector<1x4x256xf32> to vector<1x256xf32>
    %9 = vector.shape_cast %8 : vector<1x256xf32> to vector<1x1x256xf32>
    %cst_4 = arith.constant 4.000000e+00 : f32
    %10 = vector.broadcast %cst_4 : f32 to vector<1x1x256xf32>
    %11 = arith.divf %9, %10 : vector<1x1x256xf32>
    %cst_5 = arith.constant 9.99999974E-6 : f32
    %12 = vector.broadcast %cst_5 : f32 to vector<1x1x256xf32>
    %13 = arith.addf %11, %12 : vector<1x1x256xf32>
    %14 = math.rsqrt %13 : vector<1x1x256xf32>
    %15 = vector.broadcast %14 : vector<1x1x256xf32> to vector<1x4x256xf32>
    %16 = arith.mulf %6, %15 : vector<1x4x256xf32>
    %c0_6 = arith.constant 0 : index
    %c0_7 = arith.constant 0 : index
    %c0_8 = arith.constant 0 : index
    %17 = vector.load %arg3[%c0_6, %c0_7, %c0_8] : memref<1x4x256xf32, #tpu.memory_space<vmem>>, vector<1x4x256xf32>
    tpu.vector_store %arg3[%c0_6, %c0_7, %c0_8], %16 {strides = array<i32>} : memref<1x4x256xf32, #tpu.memory_space<vmem>>, vector<1x4x256xf32>,
    return
  }
  func.func @transform_0(%arg0: i32, %arg1: i32) -> (i32, i32, i32) {
    %c0_i32 = arith.constant 0 : i32
    %c0_i32_0 = arith.constant 0 : i32
    return %arg0, %c0_i32, %arg1 : i32, i32, i32
  }
  func.func @transform_1(%arg0: i32, %arg1: i32) -> (i32, i32, i32) {
    %c0_i32 = arith.constant 0 : i32
    %c0_i32_0 = arith.constant 0 : i32
    return %arg0, %c0_i32, %arg1 : i32, i32, i32
  }
}

</mosaic_0001>

<bundles_post_ra>
// kernel: tpu_custom_call.1
= control target key start
LH: loop header
LB: loop body
LE: loop exit
PB: predicated region body
PF: predicated region fallthrough
CT: control target
= control target key end

     0   :  { %6 = vsyncpa [#allocation3], 0  ;;  %s701_s0 = inlined_call_operand.hbm [shape: f32[2,4,256], index: 0, kind: input, shape index: {}]   ;;  %s702_s1 = inlined_call_operand.hbm [shape: f32[2,4,256], index: 1, kind: output, shape index: {}]  }
   0x1   :  { %8 = vsyncpa [#allocation3 + $0x1], 0 }
   0x2   :  { %9 = vsyncpa [#allocation4], 0 }
   0x3   :  { %11 = vsyncpa [#allocation4 + $0x1], 0  ;;  %s521_s6 = smov 0   ;;  %s523_s7 = smov 0  }
   0x4   :  { %s525_s8 = smov 0   ;;  %s527_s9 = smov 0  }
   0x5   :  { %s529_s10 = smov 0   ;;  %s531_s11 = smov 0  }
   0x6 LB: > { %s311_s12 = sadd.s32 4294967295, %s507_s11   ;;  %s312_s13 = sadd.s32 4294967294, %s507_s11   ;;  %s507_s11 = sphi %s531_s11, %s17_s11   ;;  %s503_s10 = sphi %s529_s10, %s718_s10   ;;  %s499_s9 = sphi %s527_s9, %s717_s9   ;;  %s495_s8 = sphi %s525_s8, %s716_s8   ;;  %s491_s7 = sphi %s523_s7, %s715_s7   ;;  %s487_s6 = sphi %s521_s6, %s714_s6  }
   0x7   : > { %s29_s14 = sadd.s32 1, %s503_s10  ;;  %s38_s15 = sadd.s32 1, %s495_s8 }
   0x8   : > { %p31_p0 = scmp.ge.s32.totalorder %s29_s14, 2  ;;  %p45_p1 = scmp.ne.s32.totalorder %s495_s8, %s491_s7 }
   0x9   : > { %p46_p2 = scmp.eq.s32.totalorder %s507_s11, 0  ;;  %p51_p3 = scmp.ne.s32.totalorder %s491_s7, %s487_s6 }
   0xa   : > { %s720_s14 = smov (%p31_p0, %s29_s14), 0  ;;  %p52_p5 = scmp.eq.s32.totalorder %s311_s12, 0 }
   0xb   : > { %p562_p4 = por %p46_p2, %p45_p1  ;;  %s33_s17 = ssub.s32 %s503_s10, %s720_s14 }
   0xc   : > { %p77_p6 = scmp.eq.s32.totalorder %s311_s12, 1  ;;  %p36_p7 = scmp.eq.s32.totalorder %s33_s17, 0 }
   0xd   : > { %p568_p8 = por %p52_p5, %p51_p3  ;;  %p83_p10 = scmp.eq.s32.totalorder %s312_s13, 1 }
   0xe   : > { %p572_p9 = por %p77_p6, %p45_p1  ;;  %p340_p13 = scmp.lt.s32.totalorder %s507_s11, 2 }
   0xf   : > { %s577_s20 = scalar_select %p36_p7, %s495_s8, %s38_s15  }
  0x10   : > { %s706_s19 = scalar_select %p572_p9, 1, 0 }
  0x11   : > { %p579_p11 = por %p83_p10, %p51_p3  ;;  %s103_s22 = sand.u32 1, %s495_s8  }
  0x12   : > { %s315_s23 = sshll.u32 %s103_s22, 3  ;;  %s326_s24 = sshll.u32 %s503_s10, 7 }
  0x13   : > { %s707_s21 = scalar_select %p579_p11, 1, 0 }
  0x14   : > { %s590_s27 = scalar_lea.hbm %s701_s0, %s326_s24  ;;  %s107_s28 = scalar_lea.vmem [#allocation2], %s315_s23 }
  0x15   : > { %s117_s29 = sshll.u32 %s107_s28, 4  ;;  %p596_p0 = pnand %p340_p13, %p562_p4  ;;  %s592_s29 = int_to_ptr.vmem [resolvable:$true] %s117_s29 }
  0x16   : > { %s104_s2 = scalar_lea.sflag [#allocation3], %s103_s22  ;;  %s395_s3 = scalar_lea.hbm %s590_s27, 128 }
  0x17   : > { %p396_p3 = scmp.ne.s32.totalorder %s590_s27, %s395_s3  ;;  %p397_p5 = pneg %p596_p0 }
  0x18   : > { %s400_s12 = scalar_lea.hbm %s701_s0, 256  ;;  %p401_p4 = scmp.lt.u32.totalorder %s590_s27, %s701_s0 }
  0x19   : > { %p398_p6 = pnand %p397_p5, %p396_p3  ;;  %p402_p10 = scmp.lt.u32.totalorder %s400_s12, %s395_s3 }
  0x1a   : > { %p404_p12 = scmp.lt.u32.totalorder %s395_s3, %s590_s27 }
  0x1b   : > { %p399_p7 = pneg %p398_p6  ;;  %p403_p13 = por %p402_p10, %p401_p4 }
  0x1d   : > { %p405_p1 = por %p404_p12, %p403_p13 }
  0x1f   : > { %p406_p2 = pnand %p405_p1, %p399_p7 }
  0x21   : > { %409 = shalt.err (!%p406_p2)
}
  0x22   : > { %s410_s16 = scalar_lea.vmem %s592_s29, 128  ;;  %s509_s17 = smov [#allocation2]  }
  0x23   : > { %p411_p3 = scmp.ne.s32.totalorder %s592_s29, %s410_s16  ;;  %s415_s22 = sshll.u32 %s509_s17, 4  ;;  %s416_s22 = int_to_ptr.vmem [resolvable:$false] %s415_s22 }
  0x24   : > { %s417_s23 = scalar_lea.vmem %s416_s22, 256  ;;  %p418_p9 = scmp.lt.s32.totalorder %s592_s29, %s416_s22 }
  0x25   : > { %p413_p6 = pnand %p411_p3, %p397_p5  ;;  %p419_p4 = scmp.lt.s32.totalorder %s417_s23, %s410_s16 }
  0x27   : > { %p414_p11 = pneg %p413_p6  ;;  %p420_p10 = por %p419_p4, %p418_p9 }
  0x29   : > { %p421_p12 = pnand %p420_p10, %p414_p11 }
  0x2b   : > { %424 = shalt.err (!%p421_p12)
}
  0x2c   : > { %335 = dma.hbm_to_vmem [thread:$0]  (!%p596_p0), %s590_s27, 128, %s592_s29, %s104_s2  }
  0x2d   : > { %p709_p1 = scmp.lt.s32.totalorder %s507_s11, 3  ;;  %p710_p2 = scmp.ge.s32.totalorder %s507_s11, 1 }
  0x2f   : > { %p123_p5 = pnand %p710_p2, %p709_p1 }
  0x30   : > { %s632_s24 = sand.u32 (!%p123_p5), 1, %s491_s7  }
  0x31   : > { %126 = sbr.rel (%p123_p5) target bundleno = 129 (0x81), region = 24  ;;  %s319_s25 = sshll.u32 (!%p123_p5), %s632_s24, 3 }
  0x32   : > { %s129_s26 = scalar_lea.sflag (!%p123_p5), [#allocation3], %s632_s24  ;;  %s132_s28 = scalar_lea.vmem (!%p123_p5), [#allocation2], %s319_s25 }
  0x38   : > { %478 = dma.done.wait (%p568_p8), %s129_s26, 128  }
  0x39   : > { %480 = vsyncadd (%p568_p8), %s129_s26, 4294967168  ;;  %vm157_vm0 = vcmask 1043456   ;;  %v153_v0 = vld [vmem:[%s132_s28] sm:$0xff]  ;;  %s150_s18 = scalar_lea.vmem [#allocation5], %s319_s25  ;;  %s327_s29 = sshll.u32 %s499_s9, 7 }
  0x3a   : > { %v155_v1 = vcombine.high %v153_v0, %v153_v0  ;;  %v158_v2 = vsel %vm157_vm0, %v153_v0, 0.0  ;;  %s227_s27 = sshll.u32 %s150_s18, 4  ;;  %s654_s3 = scalar_lea.hbm %s702_s1, %s327_s29  ;;  %s649_s27 = int_to_ptr.vmem [resolvable:$true] %s227_s27 }
  0x3b   : > { %v159_v3 = vrot.slane %v158_v2, 4  ;;  %s211_s4 = scalar_lea.sflag [#allocation4], %s632_s24  ;;  %s425_s5 = scalar_lea.vmem %s649_s27, 128 }
  0x3c   : > { %v165_v4 = vsel %vm157_vm0, %v155_v1, 0.0  ;;  %p426_p8 = scmp.ne.s32.totalorder %s649_s27, %s425_s5  ;;  %p711_p9 = scmp.ne.s32.totalorder %s706_s19, 0 }
  0x3d   : > { %v160_v5 = vadd.f32 %v159_v3, %v158_v2  ;;  %v166_v6 = vrot.slane %v165_v4, 4  ;;  %s510_s9 = smov [#allocation5]  }
  0x3e   : > { %p427_p11 = pnand %p426_p8, %p711_p9  ;;  %s429_s12 = sshll.u32 %s510_s9, 4  ;;  %s430_s12 = int_to_ptr.vmem [resolvable:$false] %s429_s12 }
  0x3f   : > { %v161_v7 = vrot.slane %v160_v5, 2  ;;  %v167_v8 = vadd.f32 %v166_v6, %v165_v4  ;;  %s431_s13 = scalar_lea.vmem %s430_s12, 256  ;;  %p432_p7 = scmp.lt.s32.totalorder %s649_s27, %s430_s12 }
  0x40   : > { %p428_p0 = pneg %p427_p11  ;;  %p433_p13 = scmp.lt.s32.totalorder %s431_s13, %s425_s5 }
  0x41   : > { %v162_v9 = vadd.f32 %v161_v7, %v160_v5  ;;  %v168_v10 = vrot.slane %v167_v8, 2 }
  0x42   : > { %p434_p3 = por %p433_p13, %p432_p7 }
  0x43   : > { %v163_v11 = vrot.slane %v162_v9, 1  ;;  %v169_v12 = vadd.f32 %v168_v10, %v167_v8 }
  0x44   : > { %p435_p6 = pnand %p434_p3, %p428_p0 }
  0x45   : > { %v164_v13 = vadd.f32 %v163_v11, %v162_v9  ;;  %v170_v14 = vrot.slane %v169_v12, 1 }
  0x47   : > { %v171_v15 = vadd.f32 %v170_v14, %v169_v12  ;;  %v173_v16 = vmul.f32 0.25, %v164_v13 }
  0x49   : > { %v174_v17 = vmul.f32 0.25, %v171_v15 }
  0x4b   : > { %v177_v18 = vcombine.low %v173_v16, %v174_v17 }
  0x4d   : > { %v179_v19 = vsub.f32 %v153_v0, %v177_v18 }
  0x4f   : > { %v180_v20 = vmul.f32 %v179_v19, %v179_v19 }
  0x51   : > { %v182_v21 = vcombine.high %v180_v20, %v180_v20  ;;  %v184_v22 = vsel %vm157_vm0, %v180_v20, 0.0 }
  0x52   : > { %v185_v23 = vrot.slane %v184_v22, 4 }
  0x53   : > { %v191_v24 = vsel %vm157_vm0, %v182_v21, 0.0 }
  0x54   : > { %v186_v25 = vadd.f32 %v185_v23, %v184_v22  ;;  %v192_v26 = vrot.slane %v191_v24, 4 }
  0x56   : > { %v187_v27 = vrot.slane %v186_v25, 2  ;;  %v193_v28 = vadd.f32 %v192_v26, %v191_v24 }
  0x58   : > { %v188_v29 = vadd.f32 %v187_v27, %v186_v25  ;;  %v194_v30 = vrot.slane %v193_v28, 2 }
  0x5a   : > { %v189_v31 = vrot.slane %v188_v29, 1  ;;  %v195_v32 = vadd.f32 %v194_v30, %v193_v28 }
  0x5c   : > { %v190_v33 = vadd.f32 %v189_v31, %v188_v29  ;;  %v196_v34 = vrot.slane %v195_v32, 1 }
  0x5e   : > { %v197_v35 = vadd.f32 %v196_v34, %v195_v32  ;;  %v198_v36 = vmul.f32 0.25, %v190_v33 }
  0x60   : > { %v199_v37 = vmul.f32 0.25, %v197_v35  ;;  %v200_v38 = vadd.f32 1e-05, %v198_v36 }
  0x62   : > { %v201_v39 = vadd.f32 1e-05, %v199_v37  ;;  %391 = vrsqrt.f32 %v200_v38 }
  0x64   : > { %393 = vrsqrt.f32 %v201_v39 }
  0x6c   : > { %v392_v40 = vpop.eup %391 }
  0x6e   : > { %v394_v41 = vpop.eup %393 }
  0x6f   : > { %v206_v42 = vcombine.low %v392_v40, %v394_v41 }
  0x71   : > { %v208_v43 = vmul.f32 %v206_v42, %v179_v19 }
  0x73   : > { %209 = vst [vmem:[%s150_s18] sm:$0xff] %v208_v43 }
  0x74   : > { %438 = shalt.err (!%p435_p6)
}
  0x75   : > { %s439_s15 = scalar_lea.hbm %s654_s3, 128  ;;  %s443_s22 = scalar_lea.hbm %s702_s1, 256 }
  0x76   : > { %p440_p4 = scmp.ne.s32.totalorder %s654_s3, %s439_s15  ;;  %p444_p1 = scmp.lt.u32.totalorder %s654_s3, %s702_s1 }
  0x77   : > { %p445_p2 = scmp.lt.u32.totalorder %s443_s22, %s439_s15  ;;  %p447_p8 = scmp.lt.u32.totalorder %s439_s15, %s654_s3 }
  0x78   : > { %p441_p10 = pnand %p440_p4, %p711_p9 }
  0x79   : > { %p446_p5 = por %p445_p2, %p444_p1 }
  0x7a   : > { %p442_p12 = pneg %p441_p10 }
  0x7b   : > { %p448_p11 = por %p447_p8, %p446_p5 }
  0x7d   : > { %p449_p0 = pnand %p448_p11, %p442_p12 }
  0x7f   : > { %452 = shalt.err (!%p449_p0)
}
  0x80   : > { %330 = dma.vmem_to_hbm [thread:$0]  (%p711_p9), %s649_s27, 128, %s654_s3, %s211_s4  }
  0x81 PF: > { %s239_s25 = sand.u32 1, %s487_s6   ;;  %p712_p7 = scmp.ne.s32.totalorder %s707_s21, 0 }
  0x82   : > { %p713_p13 = scmp.ge.s32.totalorder %s507_s11, 2  ;;  %s240_s26 = scalar_lea.sflag [#allocation4], %s239_s25 }
  0x84   : > { %p337_p3 = pnand %p713_p13, %p712_p7 }
  0x86   : > { %482 = dma.done.wait (!%p337_p3), %s240_s26, 128  }
  0x87   : > { %484 = vsyncadd (!%p337_p3), %s240_s26, 4294967168  ;;  %s17_s11 = sadd.s32 1, %s507_s11   ;;  %s714_s6 = smov %s491_s7 }
  0x88   : > { %p14_p6 = scmp.ge.s32.totalorder %s17_s11, 4   ;;  %s715_s7 = smov %s495_s8 }
  0x89   : > { %s716_s8 = smov %s577_s20  ;;  %s717_s9 = smov %s503_s10 }
  0x8a   : > { %s718_s10 = smov %s720_s14  ;;  %16 = sbr.rel (!%p14_p6) target bundleno = 6 (0x6), region = 69 }
  0x91   :  { %245 = vsyncpa [#allocation3], 1 }
  0x92   :  { %247 = vsyncpa [#allocation3 + $0x1], 1 }
  0x93   :  { %248 = vsyncpa [#allocation4], 1 }
  0x94   :  { %250 = vsyncpa [#allocation4 + $0x1], 1 }

</bundles_post_ra>
